<compile_context>
chip_gen: v7x
topology: tpu7x:2x2x1
jax: 0.10.0
libtpu: 0.0.40
codegen_flags: <defaults>
</compile_context>

<pallas_src>
import functools

import jax
import jax.numpy as jnp
from jax import lax
from jax.experimental import pallas as pl
from jax.experimental.pallas import tpu as pltpu


def _round_up(x: int, m: int) -> int:
    return (x + m - 1) // m * m


# ----------------------------- Pallas kernel --------------------------------
def _head_kernel(x_rows_ref, x_ctx_ref, wp_ref, bp_ref, wd_ref, bd_ref,
                 att_out_ref, score_ref,
                 proj_sc, m_sc, l_sc, acc_sc,
                 *, n_valid, n_pad, tile_k):
    # x_rows_ref: (TILE_N, H_pad) bf16   query row tile of CLS embeddings
    # x_ctx_ref:  (TILE_K, H_pad) bf16   context chunk of the same embeddings
    # wp_ref:     (H_pad, H_pad)  bf16   project weight, (in, out) layout
    # bp_ref:     (1, H_pad)      f32    project bias
    # wd_ref:     (2, H_pad)      f32    dense weight rows [wd1; wd2]
    # bd_ref:     (1,)            f32    dense bias (SMEM scalar)
    # proj_sc:    (TILE_N, H_pad) bf16   cached projection (depends on i only)
    # m_sc/l_sc:  (TILE_N, 1)     f32    online-softmax running max / sum
    # acc_sc:     (TILE_N, H_pad) f32    online-softmax accumulator
    k = pl.program_id(1)

    @pl.when(k == 0)
    def _init():
        # project: bf16 operands on the MXU, f32 accumulation; computed once
        # per query tile and cached across context chunks.
        proj = jnp.dot(x_rows_ref[...], wp_ref[...],
                       preferred_element_type=jnp.float32) + bp_ref[...]
        proj_sc[...] = proj.astype(jnp.bfloat16)
        m_sc[...] = jnp.full_like(m_sc, -jnp.inf)
        l_sc[...] = jnp.zeros_like(l_sc)
        acc_sc[...] = jnp.zeros_like(acc_sc)

    x_ctx = x_ctx_ref[...]                                     # (TILE_K, H_pad)
    # attention logits: proj @ x_ctx^T expressed as a contraction over the
    # last (lane) dim of both operands -> no transposed copy, no XLU transpose
    s = lax.dot_general(proj_sc[...], x_ctx,
                        dimension_numbers=(((1,), (1,)), ((), ())),
                        preferred_element_type=jnp.float32)    # (TILE_N, TILE_K)

    if n_pad > n_valid:  # static: mask zero-padded context columns
        col = k * tile_k + lax.broadcasted_iota(jnp.int32, s.shape, 1)
        s = jnp.where(col < n_valid, s, -1e30)

    # online softmax update (f32 math; exp on the EUP slot)
    m_prev = m_sc[...]
    m_new = jnp.maximum(m_prev, jnp.max(s, axis=1, keepdims=True))
    alpha = jnp.exp(m_prev - m_new)
    p = jnp.exp(s - m_new)
    l_sc[...] = alpha * l_sc[...] + jnp.sum(p, axis=1, keepdims=True)
    acc_sc[...] = alpha * acc_sc[...] + jnp.dot(
        p.astype(jnp.bfloat16), x_ctx, preferred_element_type=jnp.float32)
    m_sc[...] = m_new

    @pl.when(k == pl.num_programs(1) - 1)
    def _finalize():
        att_out = acc_sc[...] * pl.reciprocal(l_sc[...], approx=True)
        att_out_ref[...] = att_out
        # dense layer fused as VPU multiply + lane reduce (no (2H,1) matvec)
        wd = wd_ref[...]
        x_rows = x_rows_ref[...].astype(jnp.float32)
        sc = jnp.sum(x_rows * wd[0:1, :] + att_out * wd[1:2, :],
                     axis=1, keepdims=True) + bd_ref[0]        # (TILE_N, 1)
        # lane-dense score slab; wrapper slices column 0
        score_ref[...] = jnp.broadcast_to(sc, score_ref.shape)


def bert_global2_head(logits, wp, bp, wd, bd):
    """Head of BertGlobal2 after the encoder.

    logits: (N, H) f32 CLS embeddings
    wp: (H, H) nn.Linear project weight (out, in); bp: (H,)
    wd: (1, 2H) nn.Linear dense weight;            bd: (1,)
    Returns (score (N,), cat (N, 2H)).
    """
    N, H = logits.shape
    f32, bf16 = jnp.float32, jnp.bfloat16
    H_pad = _round_up(H, 128)

    # Row tile: 256 rows fills the 256x256 MXU (v6e/v7x) for large batches;
    # keep >= 2 row tiles whenever possible so the "parallel" axis can shard
    # across TensorCores; tiny batches round up to the 8-sublane minimum.
    if N >= 512:
        TILE_N = 256
    elif N >= 128:
        TILE_N = 128
    else:
        TILE_N = _round_up(N, 8)

    # Context (kv) tile for the flash-style online softmax.
    if N >= 1024:
        TILE_K = 512                       # multiple of TILE_N (=256) here
        N_pad = _round_up(N, 512)
    else:
        N_pad = _round_up(N, TILE_N)
        TILE_K = N_pad                     # single context chunk

    # one-time wrapper-side layout work: single padded bf16 copy of x,
    # padded bf16 Wp^T, padded f32 biases / dense-weight rows
    x_bf = jnp.zeros((N_pad, H_pad), bf16).at[:N, :H].set(logits.astype(bf16))
    wp_bf = jnp.zeros((H_pad, H_pad), bf16).at[:H, :H].set(wp.T.astype(bf16))
    bp_pad = jnp.zeros((1, H_pad), f32).at[0, :H].set(bp.astype(f32))
    wd_rows = (jnp.zeros((2, H_pad), f32)
               .at[0, :H].set(wd[0, :H].astype(f32))
               .at[1, :H].set(wd[0, H:].astype(f32)))
    bd_s = bd.reshape((1,)).astype(f32)

    grid = (N_pad // TILE_N, N_pad // TILE_K)

    # explicit VMEM budget: blocks + scratch + softmax temporaries, 2x headroom
    block_bytes = (2 * TILE_N * H_pad * 2        # x query tile (double-buffered)
                   + 2 * TILE_K * H_pad * 2      # x context tile (double-buffered)
                   + H_pad * H_pad * 2           # Wp (Buffered(1))
                   + H_pad * 4 + 2 * H_pad * 4   # bp, wd
                   + 2 * TILE_N * H_pad * 4      # att_out output
                   + 2 * TILE_N * 128 * 4)       # score slab output
    scratch_bytes = TILE_N * H_pad * 2 + 2 * TILE_N * 4 + TILE_N * H_pad * 4
    temp_bytes = 4 * TILE_N * TILE_K * 4 + 2 * TILE_N * H_pad * 4
    vmem_limit = int(min(max(2 * (block_bytes + scratch_bytes + temp_bytes),
                             8 * 1024 * 1024), 64 * 1024 * 1024))

    kernel = functools.partial(_head_kernel,
                               n_valid=N, n_pad=N_pad, tile_k=TILE_K)

    att_out_pad, score_pad = pl.pallas_call(
        kernel,
        grid=grid,
        in_specs=[
            pl.BlockSpec((TILE_N, H_pad), lambda i, k: (i, 0)),   # query rows
            pl.BlockSpec((TILE_K, H_pad), lambda i, k: (k, 0)),   # context rows
            pl.BlockSpec((H_pad, H_pad), lambda i, k: (0, 0),
                         pipeline_mode=pl.Buffered(1)),           # Wp^T (bf16)
            pl.BlockSpec((1, H_pad), lambda i, k: (0, 0),
                         pipeline_mode=pl.Buffered(1)),           # bp
            pl.BlockSpec((2, H_pad), lambda i, k: (0, 0),
                         pipeline_mode=pl.Buffered(1)),           # wd rows
            pl.BlockSpec(memory_space=pltpu.MemorySpace.SMEM),    # bd scalar
        ],
        out_specs=(
            pl.BlockSpec((TILE_N, H_pad), lambda i, k: (i, 0)),   # att_out
            pl.BlockSpec((TILE_N, 128), lambda i, k: (i, 0)),     # score slab
        ),
        out_shape=(
            jax.ShapeDtypeStruct((N_pad, H_pad), jnp.float32),
            jax.ShapeDtypeStruct((N_pad, 128), jnp.float32),
        ),
        scratch_shapes=[
            pltpu.VMEM((TILE_N, H_pad), jnp.bfloat16),   # cached projection
            pltpu.VMEM((TILE_N, 1), jnp.float32),        # running max m
            pltpu.VMEM((TILE_N, 1), jnp.float32),        # running sum l
            pltpu.VMEM((TILE_N, H_pad), jnp.float32),    # accumulator
        ],
        compiler_params=pltpu.CompilerParams(
            dimension_semantics=("parallel", "arbitrary"),
            vmem_limit_bytes=vmem_limit),
    )(x_bf, x_bf, wp_bf, bp_pad, wd_rows, bd_s)

    score = score_pad[:N, 0]
    # cat = [logits, att_out]: first half assembled in the wrapper (exact f32)
    cat = jnp.concatenate([logits.astype(f32), att_out_pad[:N, :H]], axis=1)
    return score, cat


# ------------------- synthetic deterministic "encoder" ----------------------
# TODO(synk): the pretrained HuggingFace BERT encoder (AutoModel) is replaced
# by a deterministic embedding stub (token + segment embedding, masked, tanh);
# only the head after `output[0][:, 0, :]` is faithfully reproduced.
def synthetic_encoder_cls(input_ids, input_mask, segment_ids, tok_emb, seg_emb):
    ids = jnp.squeeze(input_ids)       # (N, L)  torch .squeeze() semantics
    mask = jnp.squeeze(input_mask)     # (N, L)
    segs = jnp.squeeze(segment_ids)    # (N, L)
    hidden = jnp.tanh(tok_emb[ids] + seg_emb[segs])           # (N, L, H)
    hidden = hidden * mask[..., None].astype(hidden.dtype)
    return hidden[:, 0, :]                                    # mode='cls'


# ------------------------------ reference -----------------------------------
def head_reference(logits, wp, bp, wd, bd):
    proj = logits @ wp.T + bp
    att = jax.nn.softmax(proj @ logits.T, axis=1)
    att_out = att @ logits
    cat = jnp.concatenate([logits, att_out], axis=1)
    score = (cat @ wd.T + bd)[:, 0]
    return score, cat


if __name__ == "__main__":
    # Small shapes consistent with the module: N instances (batch_size=8),
    # sequence length L, hidden size H.
    N, L, H, V = 8, 8, 32, 30

    key = jax.random.PRNGKey(0)
    k_tok, k_seg, k_wp, k_bp, k_wd, k_bd, k_ids = jax.random.split(key, 7)

    # encoder stub parameters
    tok_emb = jax.random.normal(k_tok, (V, H), dtype=jnp.float32) * 0.1
    seg_emb = jax.random.normal(k_seg, (2, H), dtype=jnp.float32) * 0.1

    # head parameters (torch layout):
    #   self._project = nn.Linear(H, H)   -> W (H, H), b (H,)
    #   self._dense   = nn.Linear(2H, 1)  -> W (1, 2H), b (1,)
    wp = jax.random.normal(k_wp, (H, H), dtype=jnp.float32) * 0.1
    bp = jax.random.normal(k_bp, (H,), dtype=jnp.float32) * 0.1
    wd = jax.random.normal(k_wd, (1, 2 * H), dtype=jnp.float32) * 0.1
    bd = jax.random.normal(k_bd, (1,), dtype=jnp.float32) * 0.1

    # inputs: (N, 1, L) like the torch module's pre-squeeze inputs
    input_ids = jax.random.randint(k_ids, (N, 1, L), 0, V, dtype=jnp.int32)
    input_mask = jnp.ones((N, 1, L), dtype=jnp.int32)
    segment_ids = jnp.zeros((N, 1, L), dtype=jnp.int32)

    # encoder (plain JAX glue) -> CLS embeddings
    logits = synthetic_encoder_cls(input_ids, input_mask, segment_ids,
                                   tok_emb, seg_emb)           # (N, H)

    score, cat = bert_global2_head(logits, wp, bp, wd, bd)
    jax.block_until_ready((score, cat))

    # correctness check (bf16 MXU + approx reciprocal -> loosened tolerance)
    score_ref, cat_ref = head_reference(logits, wp, bp, wd, bd)
    assert score.shape == (N,) and cat.shape == (N, 2 * H)
    assert jnp.allclose(score, score_ref, atol=2e-2, rtol=2e-2)
    assert jnp.allclose(cat, cat_ref, atol=2e-2, rtol=2e-2)

    print("KERNEL_OK")
</pallas_src>

<mosaic_0001>
module attributes {stable_mosaic.version = 11 : i64} {
  func.func @_head_kernel(%arg0: i32, %arg1: i32, %arg2: memref<8x128xbf16, #tpu.memory_space<vmem>>, %arg3: memref<8x128xbf16, #tpu.memory_space<vmem>>, %arg4: memref<128x128xbf16, #tpu.memory_space<vmem>>, %arg5: memref<1x128xf32, #tpu.memory_space<vmem>>, %arg6: memref<2x128xf32, #tpu.memory_space<vmem>>, %arg7: memref<1xf32, #tpu.memory_space<smem>>, %arg8: memref<8x128xf32, #tpu.memory_space<vmem>>, %arg9: memref<8x128xf32, #tpu.memory_space<vmem>>, %arg10: memref<8x128xbf16, #tpu.memory_space<vmem>>, %arg11: memref<8x1xf32, #tpu.memory_space<vmem>>, %arg12: memref<8x1xf32, #tpu.memory_space<vmem>>, %arg13: memref<8x128xf32, #tpu.memory_space<vmem>>) attributes {dimension_semantics = [#tpu.dimension_semantics<parallel>, #tpu.dimension_semantics<arbitrary>], iteration_bounds = array<i64: 1, 1>, scalar_prefetch = 0 : i64, scratch_operands = 4 : i64, tpu.core_type = #tpu.core_type<tc>, window_params = [{transform_indices = @transform_0, window_bounds = array<i64: 8, 128>}, {transform_indices = @transform_1, window_bounds = array<i64: 8, 128>}, {pipeline_mode = #tpu.pipeline_mode<synchronous>, transform_indices = @transform_2, window_bounds = array<i64: 128, 128>}, {pipeline_mode = #tpu.pipeline_mode<synchronous>, transform_indices = @transform_3, window_bounds = array<i64: 1, 128>}, {pipeline_mode = #tpu.pipeline_mode<synchronous>, transform_indices = @transform_4, window_bounds = array<i64: 2, 128>}, {transform_indices = @transform_5, window_bounds = array<i64: 1>}, {transform_indices = @transform_6, window_bounds = array<i64: 8, 128>}, {transform_indices = @transform_7, window_bounds = array<i64: 8, 128>}]} {
    %c0_i32 = arith.constant 0 : i32
    %0 = arith.cmpi eq, %arg1, %c0_i32 : i32
    %1 = arith.extui %0 : i1 to i32
    %c0_i32_0 = arith.constant 0 : i32
    %2 = arith.cmpi ne, %1, %c0_i32_0 : i32
    scf.if %2 {
      %c0_21 = arith.constant 0 : index
      %c0_22 = arith.constant 0 : index
      %32 = vector.load %arg2[%c0_21, %c0_22] : memref<8x128xbf16, #tpu.memory_space<vmem>>, vector<8x128xbf16>
      %c0_23 = arith.constant 0 : index
      %c0_24 = arith.constant 0 : index
      %33 = vector.load %arg4[%c0_23, %c0_24] : memref<128x128xbf16, #tpu.memory_space<vmem>>, vector<128x128xbf16>
      %cst_25 = arith.constant dense<0.000000e+00> : vector<8x128xf32>
      %34 = tpu.matmul %32, %33, %cst_25 {dimension_numbers = #tpu.dot_dimension_numbers<[1], [0], [0], [1], [0, 0, 1, 1], [], []>} : vector<8x128xbf16>, vector<128x128xbf16>, vector<8x128xf32> -> vector<8x128xf32>
      %c0_26 = arith.constant 0 : index
      %c0_27 = arith.constant 0 : index
      %35 = vector.load %arg5[%c0_26, %c0_27] : memref<1x128xf32, #tpu.memory_space<vmem>>, vector<1x128xf32>
      %36 = vector.broadcast %35 : vector<1x128xf32> to vector<8x128xf32>
      %37 = arith.addf %34, %36 : vector<8x128xf32>
      %38 = arith.truncf %37 : vector<8x128xf32> to vector<8x128xbf16>
      %c0_28 = arith.constant 0 : index
      %c0_29 = arith.constant 0 : index
      %39 = vector.load %arg10[%c0_28, %c0_29] : memref<8x128xbf16, #tpu.memory_space<vmem>>, vector<8x128xbf16>
      tpu.vector_store %arg10[%c0_28, %c0_29], %38 {strides = array<i32>} : memref<8x128xbf16, #tpu.memory_space<vmem>>, vector<8x128xbf16>,
      %cst_30 = arith.constant 0xFF800000 : f32
      %40 = vector.broadcast %cst_30 : f32 to vector<8x1xf32>
      %c0_31 = arith.constant 0 : index
      %c0_32 = arith.constant 0 : index
      %41 = vector.load %arg11[%c0_31, %c0_32] : memref<8x1xf32, #tpu.memory_space<vmem>>, vector<8x1xf32>
      tpu.vector_store %arg11[%c0_31, %c0_32], %40 {strides = array<i32>} : memref<8x1xf32, #tpu.memory_space<vmem>>, vector<8x1xf32>,
      %cst_33 = arith.constant 0.000000e+00 : f32
      %42 = vector.broadcast %cst_33 : f32 to vector<8x1xf32>
      %c0_34 = arith.constant 0 : index
      %c0_35 = arith.constant 0 : index
      %43 = vector.load %arg12[%c0_34, %c0_35] : memref<8x1xf32, #tpu.memory_space<vmem>>, vector<8x1xf32>
      tpu.vector_store %arg12[%c0_34, %c0_35], %42 {strides = array<i32>} : memref<8x1xf32, #tpu.memory_space<vmem>>, vector<8x1xf32>,
      %cst_36 = arith.constant 0.000000e+00 : f32
      %44 = vector.broadcast %cst_36 : f32 to vector<8x128xf32>
      %c0_37 = arith.constant 0 : index
      %c0_38 = arith.constant 0 : index
      %45 = vector.load %arg13[%c0_37, %c0_38] : memref<8x128xf32, #tpu.memory_space<vmem>>, vector<8x128xf32>
      tpu.vector_store %arg13[%c0_37, %c0_38], %44 {strides = array<i32>} : memref<8x128xf32, #tpu.memory_space<vmem>>, vector<8x128xf32>,
    } else {
    }
    %c0 = arith.constant 0 : index
    %c0_1 = arith.constant 0 : index
    %3 = vector.load %arg3[%c0, %c0_1] : memref<8x128xbf16, #tpu.memory_space<vmem>>, vector<8x128xbf16>
    %c0_2 = arith.constant 0 : index
    %c0_3 = arith.constant 0 : index
    %4 = vector.load %arg10[%c0_2, %c0_3] : memref<8x128xbf16, #tpu.memory_space<vmem>>, vector<8x128xbf16>
    %cst = arith.constant dense<0.000000e+00> : vector<8x8xf32>
    %5 = tpu.matmul %4, %3, %cst {dimension_numbers = #tpu.dot_dimension_numbers<[1], [1], [0], [0], [0, 0, 1, 0], [], []>} : vector<8x128xbf16>, vector<8x128xbf16>, vector<8x8xf32> -> vector<8x8xf32>
    %c0_4 = arith.constant 0 : index
    %c0_5 = arith.constant 0 : index
    %6 = vector.load %arg11[%c0_4, %c0_5] : memref<8x1xf32, #tpu.memory_space<vmem>>, vector<8x1xf32>
    %cst_6 = arith.constant dense<0xFF800000> : vector<8xf32>
    %7 = vector.multi_reduction <maximumf>, %5, %cst_6 [1] : vector<8x8xf32> to vector<8xf32>
    %8 = vector.shape_cast %7 : vector<8xf32> to vector<8x1xf32>
    %9 = arith.maximumf %6, %8 : vector<8x1xf32>
    %10 = arith.subf %6, %9 : vector<8x1xf32>
    %11 = math.exp %10 : vector<8x1xf32>
    %12 = vector.broadcast %9 : vector<8x1xf32> to vector<8x8xf32>
    %13 = arith.subf %5, %12 : vector<8x8xf32>
    %14 = math.exp %13 : vector<8x8xf32>
    %c0_7 = arith.constant 0 : index
    %c0_8 = arith.constant 0 : index
    %15 = vector.load %arg12[%c0_7, %c0_8] : memref<8x1xf32, #tpu.memory_space<vmem>>, vector<8x1xf32>
    %16 = arith.mulf %11, %15 : vector<8x1xf32>
    %cst_9 = arith.constant dense<0.000000e+00> : vector<8xf32>
    %17 = vector.multi_reduction <add>, %14, %cst_9 [1] : vector<8x8xf32> to vector<8xf32>
    %18 = vector.shape_cast %17 : vector<8xf32> to vector<8x1xf32>
    %19 = arith.addf %16, %18 : vector<8x1xf32>
    %c0_10 = arith.constant 0 : index
    %c0_11 = arith.constant 0 : index
    %20 = vector.load %arg12[%c0_10, %c0_11] : memref<8x1xf32, #tpu.memory_space<vmem>>, vector<8x1xf32>
    tpu.vector_store %arg12[%c0_10, %c0_11], %19 {strides = array<i32>} : memref<8x1xf32, #tpu.memory_space<vmem>>, vector<8x1xf32>,
    %c0_12 = arith.constant 0 : index
    %c0_13 = arith.constant 0 : index
    %21 = vector.load %arg13[%c0_12, %c0_13] : memref<8x128xf32, #tpu.memory_space<vmem>>, vector<8x128xf32>
    %22 = vector.broadcast %11 : vector<8x1xf32> to vector<8x128xf32>
    %23 = arith.mulf %22, %21 : vector<8x128xf32>
    %24 = arith.truncf %14 : vector<8x8xf32> to vector<8x8xbf16>
    %cst_14 = arith.constant dense<0.000000e+00> : vector<8x128xf32>
    %25 = tpu.matmul %24, %3, %cst_14 {dimension_numbers = #tpu.dot_dimension_numbers<[1], [0], [0], [1], [0, 0, 1, 1], [], []>} : vector<8x8xbf16>, vector<8x128xbf16>, vector<8x128xf32> -> vector<8x128xf32>
    %26 = arith.addf %23, %25 : vector<8x128xf32>
    %c0_15 = arith.constant 0 : index
    %c0_16 = arith.constant 0 : index
    %27 = vector.load %arg13[%c0_15, %c0_16] : memref<8x128xf32, #tpu.memory_space<vmem>>, vector<8x128xf32>
    tpu.vector_store %arg13[%c0_15, %c0_16], %26 {strides = array<i32>} : memref<8x128xf32, #tpu.memory_space<vmem>>, vector<8x128xf32>,
    %c0_17 = arith.constant 0 : index
    %c0_18 = arith.constant 0 : index
    %28 = vector.load %arg11[%c0_17, %c0_18] : memref<8x1xf32, #tpu.memory_space<vmem>>, vector<8x1xf32>
    tpu.vector_store %arg11[%c0_17, %c0_18], %9 {strides = array<i32>} : memref<8x1xf32, #tpu.memory_space<vmem>>, vector<8x1xf32>,
    %c0_i32_19 = arith.constant 0 : i32
    %29 = arith.cmpi eq, %arg1, %c0_i32_19 : i32
    %30 = arith.extui %29 : i1 to i32
    %c0_i32_20 = arith.constant 0 : i32
    %31 = arith.cmpi ne, %30, %c0_i32_20 : i32
    scf.if %31 {
      %c0_21 = arith.constant 0 : index
      %c0_22 = arith.constant 0 : index
      %32 = vector.load %arg13[%c0_21, %c0_22] : memref<8x128xf32, #tpu.memory_space<vmem>>, vector<8x128xf32>
      %c0_23 = arith.constant 0 : index
      %c0_24 = arith.constant 0 : index
      %33 = vector.load %arg12[%c0_23, %c0_24] : memref<8x1xf32, #tpu.memory_space<vmem>>, vector<8x1xf32>
      %34 = tpu.reciprocal %33 {approx = true} : vector<8x1xf32> -> vector<8x1xf32>
      %35 = vector.broadcast %34 : vector<8x1xf32> to vector<8x128xf32>
      %36 = arith.mulf %32, %35 : vector<8x128xf32>
      %c0_25 = arith.constant 0 : index
      %c0_26 = arith.constant 0 : index
      %37 = vector.load %arg8[%c0_25, %c0_26] : memref<8x128xf32, #tpu.memory_space<vmem>>, vector<8x128xf32>
      tpu.vector_store %arg8[%c0_25, %c0_26], %36 {strides = array<i32>} : memref<8x128xf32, #tpu.memory_space<vmem>>, vector<8x128xf32>,
      %c0_27 = arith.constant 0 : index
      %c0_28 = arith.constant 0 : index
      %38 = vector.load %arg6[%c0_27, %c0_28] : memref<2x128xf32, #tpu.memory_space<vmem>>, vector<2x128xf32>
      %c0_29 = arith.constant 0 : index
      %c0_30 = arith.constant 0 : index
      %39 = vector.load %arg2[%c0_29, %c0_30] : memref<8x128xbf16, #tpu.memory_space<vmem>>, vector<8x128xbf16>
      %40 = arith.extf %39 : vector<8x128xbf16> to vector<8x128xf32>
      %41 = vector.extract_strided_slice %38 {offsets = [0, 0], sizes = [1, 128], strides = [1, 1]} : vector<2x128xf32> to vector<1x128xf32>
      %42 = vector.broadcast %41 : vector<1x128xf32> to vector<8x128xf32>
      %43 = arith.mulf %40, %42 : vector<8x128xf32>
      %44 = vector.extract_strided_slice %38 {offsets = [1, 0], sizes = [1, 128], strides = [1, 1]} : vector<2x128xf32> to vector<1x128xf32>
      %45 = vector.broadcast %44 : vector<1x128xf32> to vector<8x128xf32>
      %46 = arith.mulf %36, %45 : vector<8x128xf32>
      %47 = arith.addf %43, %46 : vector<8x128xf32>
      %cst_31 = arith.constant dense<0.000000e+00> : vector<8xf32>
      %48 = vector.multi_reduction <add>, %47, %cst_31 [1] : vector<8x128xf32> to vector<8xf32>
      %49 = vector.shape_cast %48 : vector<8xf32> to vector<8x1xf32>
      %c0_32 = arith.constant 0 : index
      %50 = memref.load %arg7[%c0_32] : memref<1xf32, #tpu.memory_space<smem>>
      %51 = vector.broadcast %50 : f32 to vector<8x1xf32>
      %52 = arith.addf %49, %51 : vector<8x1xf32>
      %53 = vector.shape_cast %52 : vector<8x1xf32> to vector<8x1xf32>
      %54 = vector.broadcast %53 : vector<8x1xf32> to vector<8x128xf32>
      %c0_33 = arith.constant 0 : index
      %c0_34 = arith.constant 0 : index
      %55 = vector.load %arg9[%c0_33, %c0_34] : memref<8x128xf32, #tpu.memory_space<vmem>>, vector<8x128xf32>
      tpu.vector_store %arg9[%c0_33, %c0_34], %54 {strides = array<i32>} : memref<8x128xf32, #tpu.memory_space<vmem>>, vector<8x128xf32>,
    } else {
    }
    return
  }
  func.func @transform_0(%arg0: i32, %arg1: i32) -> (i32, i32) {
    %c0_i32 = arith.constant 0 : i32
    %c0_i32_0 = arith.constant 0 : i32
    return %arg0, %c0_i32 : i32, i32
  }
  func.func @transform_1(%arg0: i32, %arg1: i32) -> (i32, i32) {
    %c0_i32 = arith.constant 0 : i32
    %c0_i32_0 = arith.constant 0 : i32
    return %arg1, %c0_i32 : i32, i32
  }
  func.func @transform_2(%arg0: i32, %arg1: i32) -> (i32, i32) {
    %c0_i32 = arith.constant 0 : i32
    %c0_i32_0 = arith.constant 0 : i32
    %c0_i32_1 = arith.constant 0 : i32
    return %c0_i32, %c0_i32_0 : i32, i32
  }
  func.func @transform_3(%arg0: i32, %arg1: i32) -> (i32, i32) {
    %c0_i32 = arith.constant 0 : i32
    %c0_i32_0 = arith.constant 0 : i32
    %c0_i32_1 = arith.constant 0 : i32
    return %c0_i32, %c0_i32_0 : i32, i32
  }
  func.func @transform_4(%arg0: i32, %arg1: i32) -> (i32, i32) {
    %c0_i32 = arith.constant 0 : i32
    %c0_i32_0 = arith.constant 0 : i32
    %c0_i32_1 = arith.constant 0 : i32
    return %c0_i32, %c0_i32_0 : i32, i32
  }
  func.func @transform_5(%arg0: i32, %arg1: i32) -> i32 {
    %c0_i32 = arith.constant 0 : i32
    %c0_i32_0 = arith.constant 0 : i32
    return %c0_i32 : i32
  }
  func.func @transform_6(%arg0: i32, %arg1: i32) -> (i32, i32) {
    %c0_i32 = arith.constant 0 : i32
    %c0_i32_0 = arith.constant 0 : i32
    return %arg0, %c0_i32 : i32, i32
  }
  func.func @transform_7(%arg0: i32, %arg1: i32) -> (i32, i32) {
    %c0_i32 = arith.constant 0 : i32
    %c0_i32_0 = arith.constant 0 : i32
    return %arg0, %c0_i32 : i32, i32
  }
}

</mosaic_0001>

<bundles_post_ra>
// kernel: tpu_custom_call.1
= control target key start
LH: loop header
LB: loop body
LE: loop exit
PB: predicated region body
PF: predicated region fallthrough
CT: control target
= control target key end

     0   :  { %14 = vsyncpa [#allocation8], 0  ;;  %s669_s0 = inlined_call_operand.hbm [shape: bf16[8,128], index: 0, kind: input, shape index: {}]   ;;  %s670_s1 = inlined_call_operand.vmem [shape: bf16[8,128], index: 1, kind: input, shape index: {}]   ;;  %s671_s2 = inlined_call_operand.hbm [shape: bf16[128,128], index: 2, kind: input, shape index: {}]   ;;  %s672_s3 = inlined_call_operand.vmem [shape: f32[1,128], index: 3, kind: input, shape index: {}]   ;;  %s673_s4 = inlined_call_operand.vmem [shape: f32[2,128], index: 4, kind: input, shape index: {}]   ;;  %s674_s5 = inlined_call_operand.<no memory space> [shape: f32[1], index: 5, kind: input, shape index: {}]   ;;  %s675_s6 = inlined_call_operand.hbm [shape: f32[8,128], index: 6, kind: output, shape index: {0}]   ;;  %s676_s7 = inlined_call_operand.hbm [shape: f32[8,128], index: 7, kind: output, shape index: {1}]  }
   0x1   :  { %15 = vsyncpa [#allocation11], 0 }
   0x2   :  { %16 = vsyncpa [#allocation9], 0 }
   0x3   :  { %17 = vsyncpa [#allocation14], 0  ;;  %s542_s24 = smov [#allocation7]   ;;  %s543_s26 = smov [#allocation10]  }
   0x4   :  { %s24_s25 = sshll.u32 %s542_s24, 4  ;;  %s35_s27 = sshll.u32 %s543_s26, 4  ;;  %s25_s25 = int_to_ptr.vmem [resolvable:$true] %s24_s25  ;;  %s592_s27 = int_to_ptr.vmem [resolvable:$true] %s35_s27 }
   0x5   :  { %s446_s30 = scalar_lea.hbm %s669_s0, 64 }
   0x6   :  { %p447_p0 = scmp.ne.s32.totalorder %s669_s0, %s446_s30  ;;  %p450_p1 = scmp.lt.u32.totalorder %s446_s30, %s669_s0 }
   0x8   :  { %p452_p2 = pnand %p450_p1, %p447_p0 }
   0xa   :  { %455 = shalt.err (!%p452_p2)
}
   0xb   :  { %s456_s12 = scalar_lea.vmem %s25_s25, 64  ;;  %p461_p4 = scmp.lt.s32.totalorder %s25_s25, %s25_s25 }
   0xc   :  { %p457_p3 = scmp.ne.s32.totalorder %s25_s25, %s456_s12  ;;  %p462_p5 = scmp.lt.s32.totalorder %s456_s12, %s456_s12 }
   0xe   :  { %p463_p6 = por %p462_p5, %p461_p4 }
  0x10   :  { %p464_p7 = pnand %p463_p6, %p457_p3 }
  0x12   :  { %467 = shalt.err (!%p464_p7)
}
  0x13   :  { %27 = dma.hbm_to_vmem [thread:$0]  %s669_s0, 64, %s25_s25, [#allocation8]  }
  0x14   :  { %s468_s17 = scalar_lea.hbm %s671_s2, 1024 }
  0x15   :  { %p469_p8 = scmp.ne.s32.totalorder %s671_s2, %s468_s17  ;;  %p472_p9 = scmp.lt.u32.totalorder %s468_s17, %s671_s2 }
  0x17   :  { %p474_p10 = pnand %p472_p9, %p469_p8 }
  0x19   :  { %477 = shalt.err (!%p474_p10)
}
  0x1a   :  { %s478_s22 = scalar_lea.vmem %s592_s27, 1024  ;;  %p483_p12 = scmp.lt.s32.totalorder %s592_s27, %s592_s27 }
  0x1b   :  { %p479_p11 = scmp.ne.s32.totalorder %s592_s27, %s478_s22  ;;  %p484_p13 = scmp.lt.s32.totalorder %s478_s22, %s478_s22 }
  0x1d   :  { %p485_p0 = por %p484_p13, %p483_p12 }
  0x1f   :  { %p486_p1 = pnand %p485_p0, %p479_p11 }
  0x21   :  { %489 = shalt.err (!%p486_p1)
}
  0x22   :  { %s544_s0 = smov 64   ;;  %s545_s23 = smov 4  }
  0x23   :  { %41 = dma.hbm_to_vmem [thread:$0]  %s671_s2, 1024, %s592_s27, [#allocation11], %s544_s0, %s544_s0, %s545_s23  }
  0x24   :  { %534 = dma.done.wait [#allocation8], 64  }
  0x25   :  { %535 = vsyncadd [#allocation8], 4294967232 }
  0x26   :  { %536 = dma.done.wait [#allocation11], 1024  }
  0x27   :  { %537 = vsyncadd [#allocation11], 4294966272  ;;  %v546_v0 = vmov 0.0   ;;  %vm547_vm0 = vmmov 0   ;;  %v432_v1 = vld [vmem:[#allocation10] sm:$0xff]   ;;  %v433_v2 = vld [vmem:[#allocation10 + $0x8] sm:$0xff]   ;;  %v318_v49 = vlaneseq }
  0x28   :  { %388 = vmatprep.subr.bf16.mxu0 %v546_v0  ;;  %404 = vmatprep.mubr.msk.bf16.mxu0 %vm547_vm0, %v546_v0  ;;  %v434_v3 = vld [vmem:[#allocation10 + $0x10] sm:$0xff]   ;;  %v435_v4 = vld [vmem:[#allocation10 + $0x18] sm:$0xff]   ;;  %v436_v5 = vld [vmem:[#allocation10 + $0x20] sm:$0xff]   ;;  %vm255_vm1 = vcmask 1043456   ;;  %vm173_vm2 = vcmask 7168   ;;  %v548_v20 = vmov -inf  }
  0x29   :  { %408 = vmatprep.subr.bf16.mxu1 %v546_v0  ;;  %410 = vmatprep.mubr.msk.bf16.mxu1 %vm547_vm0, %v546_v0  ;;  %v437_v6 = vld [vmem:[#allocation10 + $0x28] sm:$0xff]   ;;  %v438_v7 = vld [vmem:[#allocation10 + $0x30] sm:$0xff]   ;;  %v439_v8 = vld [vmem:[#allocation10 + $0x38] sm:$0xff]   ;;  %174 = vst.msk [vmem:[#allocation3] sm:$0xff] %vm173_vm2, %v548_v20  ;;  %vm220_vm3 = vcmask 64512   ;;  %v549_v26 = vmov 0  }
  0x2a   :  { %389 = vmatpush3.bf16.msra.mxu0 %v432_v1  ;;  %v59_v9 = vld [vmem:[#allocation7] sm:$0xf]  ;;  %v177_v10 = vld [vmem:[%s670_s1] sm:$0xf]  ;;  %175 = vst.msk [vmem:[#allocation4] sm:$0xff] %vm173_vm2, %v546_v0  ;;  %430 = vset.pattern.permute.xlu0 %v549_v26  ;;  %v319_v50 = vshrl.u32 %v318_v49, 7 }
  0x2b   :  { %390 = vmatprep.subr.bf16.mxu0 %v546_v0  ;;  %409 = vmatpush3.bf16.xpose.msra.mxu1 %v177_v10  ;;  %v365_v11 = vld [vmem:[%s672_s3] ss:$0 sm:$0xff]  ;;  %v257_v18 = vsel %vm255_vm1, %v177_v10, 0  ;;  %v316_v54 = vld [vmem:[#allocation7] sm:$0xf]  ;;  %s550_s29 = smov [#allocation12]  }
  0x2c   :  { %414 = vmatprep.subr.bf16.mxu1 %v546_v0  ;;  %431 = vset.pattern.permute.xlu1 %v549_v26  ;;  %v320_v51 = vsub.s32 0, %v319_v50  ;;  %v315_v53 = vld [vmem:[%s673_s4] sm:$0x3]  ;;  %v325_v55 = vsub.s32 1, %v319_v50  ;;  %v317_v57 = vunpack.c.l.bf16 %v316_v54  ;;  %s341_s30 = sshll.u32 %s550_s29, 4  ;;  %s342_s30 = int_to_ptr.vmem [resolvable:$true] %s341_s30 }
  0x2d   :  { %s490_s8 = scalar_lea.vmem %s342_s30, 128  ;;  %p495_p3 = scmp.lt.s32.totalorder %s342_s30, %s342_s30 }
  0x2e   :  { %391 = vmatpush3.bf16.msra.mxu0 %v433_v2  ;;  %v321_v58 = vrot.slane %v315_v53, %v320_v51  ;;  %v326_v60 = vrot.slane %v315_v53, %v325_v55  ;;  %p491_p2 = scmp.ne.s32.totalorder %s342_s30, %s490_s8  ;;  %p496_p4 = scmp.lt.s32.totalorder %s490_s8, %s490_s8 }
  0x2f   :  { %392 = vmatprep.subr.bf16.mxu0 %v546_v0 }
  0x30   :  { %v219_v27 = vld [vmem:[#allocation3] sm:$0xff]  ;;  %v322_v63 = vmul.f32 %v321_v58, %v317_v57  ;;  %p497_p5 = por %p496_p4, %p495_p3 }
  0x31   :  { %v236_v39 = vld [vmem:[#allocation4] sm:$0xff] }
  0x32   :  { %393 = vmatpush3.bf16.msra.mxu0 %v434_v3  ;;  %p498_p6 = pnand %p497_p5, %p491_p2 }
  0x33   :  { %394 = vmatprep.subr.bf16.mxu0 %v546_v0 }
  0x36   :  { %395 = vmatpush3.bf16.msra.mxu0 %v435_v4 }
  0x37   :  { %396 = vmatprep.subr.bf16.mxu0 %v546_v0 }
  0x3a   :  { %397 = vmatpush3.bf16.msra.mxu0 %v436_v5 }
  0x3b   :  { %398 = vmatprep.subr.bf16.mxu0 %v546_v0 }
  0x3e   :  { %399 = vmatpush3.bf16.msra.mxu0 %v437_v6 }
  0x3f   :  { %400 = vmatprep.subr.bf16.mxu0 %v546_v0 }
  0x42   :  { %401 = vmatpush3.bf16.msra.mxu0 %v438_v7 }
  0x43   :  { %402 = vmatprep.subr.bf16.mxu0 %v546_v0 }
  0x46   :  { %403 = vmatpush3.bf16.msra.mxu0 %v439_v8 }
  0x49   :  { %405 = vmatmul.mubr.bf16.vlgmr.msra.gmra.mrb[0].mxu0 %v59_v9 }
 0x11c   :  { %v165_v12 = vpop.f32.mrb[0].mxu0 }
 0x11d   :  { %v166_v13 = vadd.f32 %v365_v11, %v165_v12  ;;  %v406_v14 = vpop.f32.mrb[1].mxu0 }
 0x11e   :  { %v168_v15 = vpop.f32.mrb[2].mxu0 }
 0x11f   :  { %v171_v16 = vpack.c.bf16 %v166_v13, %v166_v13  ;;  %v407_v17 = vpop.f32.mrb[3].mxu0 }
 0x121   :  { %172 = vst [vmem:[#allocation2] sm:$0xf] %v171_v16 }
 0x128   :  { %v178_v19 = vld [vmem:[#allocation2] sm:$0xf] }
 0x129   :  { %411 = vmatmul.mubr.bf16.vlgmr.msra.gmra.mrb[0].mxu1 %v178_v19 }
 0x12a   :  { %415 = vmatpush3.bf16.msra.mxu1 %v257_v18  ;;  %416 = vmatprep.mubr.msk.bf16.mxu1 %vm547_vm0, %v546_v0 }
 0x1fc   :  { %v213_v21 = vpop.f32.mrb[0].mxu1 }
 0x1fd   :  { %v412_v22 = vpop.f32.mrb[1].mxu1  ;;  %v221_v23 = vsel %vm220_vm3, %v213_v21, -inf }
 0x1fe   :  { %222 = vmax.xlane.f32.xlu0 %v221_v23  ;;  %v216_v24 = vpop.f32.mrb[2].mxu1 }
 0x1ff   :  { %v413_v25 = vpop.f32.mrb[3].mxu1 }
 0x28b   :  { %v223_v28 = vpop.xlane.xlu0 %222 }
 0x28c   :  { %v224_v29 = vmax.f32 %v219_v27, %v223_v28 }
 0x28e   :  { %v225_v30 = vsub.f32 %v219_v27, %v224_v29  ;;  %301 = vst.msk [vmem:[#allocation3] sm:$0xff] %vm173_vm2, %v224_v29  ;;  %230 = vperm.xlu0 %430, %v224_v29  }
 0x290   :  { %v226_v37 = vmul.f32 1.442695, %v225_v30 }
 0x30d   :  { %v231_v31 = vpop.permute.xlu0 %230 }
 0x30e   :  { %v233_v32 = vsub.f32 %v213_v21, %v231_v31 }
 0x310   :  { %v234_v33 = vmul.f32 1.442695, %v233_v32 }
 0x312   :  { %440 = vpow2.f32 %v234_v33 }
 0x313   :  { %442 = vpow2.f32 %v226_v37 }
 0x31c   :  { %v441_v34 = vpop.eup %440 }
 0x31d   :  { %v238_v35 = vsel %vm220_vm3, %v441_v34, 0.0  ;;  %v251_v36 = vpack.c.bf16 %v441_v34, %v441_v34  ;;  %v443_v38 = vpop.eup %442 }
 0x31e   :  { %239 = vadd.xlane.f32.xlu1 %v238_v35  ;;  %v237_v40 = vmul.f32 %v443_v38, %v236_v39 }
 0x31f   :  { %417 = vmatmul.mubr.msk.bf16.vlgmr.msra.gmra.mrb[4].mxu1 %vm220_vm3, %v251_v36 }
 0x32f   :  { %247 = vperm.xlu1 %431, %v443_v38  }
 0x3ab   :  { %v240_v41 = vpop.xlane.xlu1 %239 }
 0x3ac   :  { %v241_v42 = vadd.f32 %v240_v41, %v237_v40 }
 0x3ae   :  { %243 = vst.msk [vmem:[#allocation4] sm:$0xff] %vm173_vm2, %v241_v42 }
 0x3af   :  { %v248_v52 = vpop.permute.xlu1 %247 }
 0x3b0   :  { %v250_v56 = vmul.f32 0.0, %v248_v52 }
 0x3b5   :  { %v306_v43 = vld [vmem:[#allocation4] sm:$0xff] }
 0x3b6   :  { %444 = vrcp.f32 %v306_v43 }
 0x3c0   :  { %v445_v44 = vpop.eup %444 }
 0x3c1   :  { %310 = vperm.xlu1 %431, %v445_v44  }
 0x3f2   :  { %v293_v45 = vpop.f32.mrb[4].mxu1 }
 0x3f3   :  { %v418_v46 = vpop.f32.mrb[5].mxu1  ;;  %v299_v59 = vadd.f32 %v293_v45, %v250_v56 }
 0x3f4   :  { %v296_v47 = vpop.f32.mrb[6].mxu1 }
 0x3f5   :  { %v419_v48 = vpop.f32.mrb[7].mxu1 }
 0x440   :  { %v311_v61 = vpop.permute.xlu1 %310 }
 0x441   :  { %v313_v62 = vmul.f32 %v311_v61, %v299_v59 }
 0x443   :  { %v327_v0 = vmul.f32 %v326_v60, %v313_v62  ;;  %314 = vst [vmem:[#allocation12] sm:$0xff] %v313_v62 }
 0x445   :  { %v328_v1 = vadd.f32 %v327_v0, %v322_v63 }
 0x447   :  { %329 = vadd.xlane.f32.xlu1 %v328_v1 }
 0x448   :  { %501 = shalt.err (!%p498_p6)
}
 0x449   :  { %s502_s10 = scalar_lea.hbm %s675_s6, 128 }
 0x44a   :  { %p503_p7 = scmp.ne.s32.totalorder %s675_s6, %s502_s10  ;;  %p506_p8 = scmp.lt.u32.totalorder %s502_s10, %s675_s6 }
 0x44c   :  { %p508_p9 = pnand %p506_p8, %p503_p7 }
 0x44e   :  { %511 = shalt.err (!%p508_p9)
}
 0x44f   :  { %344 = dma.vmem_to_hbm [thread:$0]  %s342_s30, 128, %s675_s6, [#allocation9]   ;;  %v332_v2 = vstv %s674_s5 }
 0x450   :  { %s551_s19 = smov [#allocation13]  }
 0x451   :  { %s351_s20 = sshll.u32 %s551_s19, 4  ;;  %s352_s20 = int_to_ptr.vmem [resolvable:$true] %s351_s20 }
 0x452   :  { %s512_s21 = scalar_lea.vmem %s352_s20, 128  ;;  %p517_p11 = scmp.lt.s32.totalorder %s352_s20, %s352_s20 }
 0x453   :  { %p513_p10 = scmp.ne.s32.totalorder %s352_s20, %s512_s21  ;;  %p518_p12 = scmp.lt.s32.totalorder %s512_s21, %s512_s21 }
 0x455   :  { %p519_p13 = por %p518_p12, %p517_p11 }
 0x457   :  { %p520_p0 = pnand %p519_p13, %p513_p10 }
 0x4d4   :  { %v330_v3 = vpop.xlane.xlu1 %329 }
 0x4d5   :  { %v333_v4 = vadd.f32 %v332_v2, %v330_v3 }
 0x4d7   :  { %334 = vst [vmem:[#allocation13] sm:$0xff] %v333_v4 }
 0x4d8   :  { %523 = shalt.err (!%p520_p0)
}
 0x4d9   :  { %s524_s6 = scalar_lea.hbm %s676_s7, 128 }
 0x4da   :  { %p525_p1 = scmp.ne.s32.totalorder %s676_s7, %s524_s6  ;;  %p528_p2 = scmp.lt.u32.totalorder %s524_s6, %s676_s7 }
 0x4dc   :  { %p530_p3 = pnand %p528_p2, %p525_p1 }
 0x4de   :  { %533 = shalt.err (!%p530_p3)
}
 0x4df   :  { %354 = dma.vmem_to_hbm [thread:$0]  %s352_s20, 128, %s676_s7, [#allocation14]  }
 0x4e0   :  { %538 = dma.done.wait [#allocation9], 128  }
 0x4e1   :  { %539 = vsyncadd [#allocation9], 4294967168 }
 0x4e2   :  { %540 = dma.done.wait [#allocation14], 128  }
 0x4e3   :  { %541 = vsyncadd [#allocation14], 4294967168 }
 0x4e4   :  { %361 = vsyncpa [#allocation8], 1 }
 0x4e5   :  { %362 = vsyncpa [#allocation11], 1 }
 0x4e6   :  { %363 = vsyncpa [#allocation9], 1 }
 0x4e7   :  { %364 = vsyncpa [#allocation14], 1 }

</bundles_post_ra>
